<compile_context>
chip_gen: v7x
topology: tpu7x:2x2x1
jax: 0.10.0
libtpu: 0.0.40
codegen_flags: <defaults>
</compile_context>

<pallas_src>
import functools

import jax
import jax.numpy as jnp
from jax.experimental import pallas as pl
from jax.experimental.pallas import tpu as pltpu


def _round_up(x, m):
    return ((x + m - 1) // m) * m


# ----------------------------- fused kernel ---------------------------------
def _classification_kernel(*refs, num_linears):
    """Fused MLP forward for one batch block.

    refs layout:
      refs[0]                      : x block  (block_b, input_size)   f32
      refs[1 + 2*i], refs[2 + 2*i] : W_i (in_i, out_i) bf16, b_i (1, out_i) f32
      refs[-1]                     : out block (block_b, out_padded)  f32

    Linear layers alternate fc_layer / output_layer of each FullyConnected
    block, so ReLU is applied after every even-indexed linear.
    """
    x_ref = refs[0]
    out_ref = refs[-1]
    param_refs = refs[1:-1]

    h = x_ref[...].astype(jnp.float32)
    for i in range(num_linears):
        w = param_refs[2 * i][...]          # bf16 (in_i, out_i)
        b = param_refs[2 * i + 1][...]      # f32  (1,  out_i)
        # MXU: bf16 x bf16 -> f32 accumulation; bias add / ReLU in f32 on VPU.
        h = jnp.dot(h.astype(jnp.bfloat16), w,
                    preferred_element_type=jnp.float32) + b
        if i % 2 == 0:
            h = jnp.maximum(h, 0.0)   # ReLU after the fc_layer of each block
        # Dropout: identity in eval mode.
    out_ref[...] = h.astype(out_ref.dtype)


def classification_forward(x, layers):
    """x: (B, input_size) f32; layers: list of (W (in,out) bf16, b (1,out) f32)."""
    B, input_size = x.shape
    num_linears = len(layers)
    out_dim = layers[-1][0].shape[1]

    # --- lane-dense output: zero-pad final layer columns to a 128 multiple ---
    out_pad = _round_up(out_dim, 128)
    padded_layers = list(layers)
    if out_pad != out_dim:
        W_last, b_last = padded_layers[-1]
        W_last = jnp.pad(W_last, ((0, 0), (0, out_pad - out_dim)))
        b_last = jnp.pad(b_last, ((0, 0), (0, out_pad - out_dim)))
        padded_layers[-1] = (W_last, b_last)

    # --- batch padding + B-tiled grid (weights stay VMEM-resident) ----------
    B_pad = _round_up(max(B, 8), 8)
    block_b = min(256, B_pad)
    B_pad = _round_up(B_pad, block_b)
    if B_pad != B:
        x = jnp.pad(x, ((0, B_pad - B), (0, 0)))
    grid = (B_pad // block_b,)

    flat_params = []
    for W, b in padded_layers:
        flat_params += [W, b]

    in_specs = [pl.BlockSpec((block_b, input_size), lambda i: (i, 0))]
    for W, b in padded_layers:
        # Constant block index -> parameters are fetched once and re-used
        # across all batch grid steps.
        in_specs.append(pl.BlockSpec(W.shape, lambda i: (0, 0)))
        in_specs.append(pl.BlockSpec(b.shape, lambda i: (0, 0)))
    out_specs = pl.BlockSpec((block_b, out_pad), lambda i: (i, 0))

    # --- VMEM budget & cost estimate -----------------------------------------
    param_bytes = sum(int(W.nbytes) + int(b.nbytes) for W, b in padded_layers)
    max_width = max([input_size] + [W.shape[1] for W, _ in padded_layers])
    act_bytes = block_b * max_width * 4
    io_bytes = 2 * block_b * (input_size + out_pad) * 4      # double-buffered I/O
    vmem_needed = 2 * param_bytes + io_bytes + 4 * act_bytes + (4 << 20)
    vmem_limit = int(min(max(vmem_needed, 32 << 20), 64 << 20))

    flops = 2 * B_pad * sum(W.shape[0] * W.shape[1] for W, _ in padded_layers)
    bytes_accessed = int(x.nbytes) + param_bytes + B_pad * out_pad * 4

    kernel = functools.partial(_classification_kernel, num_linears=num_linears)

    out = pl.pallas_call(
        kernel,
        out_shape=jax.ShapeDtypeStruct((B_pad, out_pad), jnp.float32),
        grid=grid,
        in_specs=in_specs,
        out_specs=out_specs,
        compiler_params=pltpu.CompilerParams(
            dimension_semantics=("parallel",),
            vmem_limit_bytes=vmem_limit,
        ),
        cost_estimate=pl.CostEstimate(
            flops=flops, transcendentals=0, bytes_accessed=bytes_accessed),
    )(x, *flat_params)

    return out[:B, :out_dim]


# ------------------------------ parameters ----------------------------------
def init_linear(key, din, dout):
    """PyTorch-style Linear init; weight pre-transposed (din, dout), bf16 storage."""
    kw, kb = jax.random.split(key)
    bound = float(din) ** -0.5
    W = jax.random.uniform(kw, (din, dout), jnp.float32, -bound, bound)
    b = jax.random.uniform(kb, (1, dout), jnp.float32, -bound, bound)
    return W.astype(jnp.bfloat16), b


class ClassificationPallas:
    """Mirrors Classification(input_size, fc_layers_num, fc_units, output_size, rho)."""

    def __init__(self, input_size, fc_layers_num, fc_units, output_size, rho, key):
        self.rho = rho  # dropout prob (unused in eval mode)

        # Per-FullyConnected block dims: (block_in, fc_units, block_out)
        block_dims = []
        if fc_layers_num == 1:
            block_dims.append((input_size, fc_units, output_size))
        else:
            for i in range(fc_layers_num - 1):
                d_in = input_size if i == 0 else fc_units
                block_dims.append((d_in, fc_units, fc_units))
            block_dims.append((fc_units, fc_units, output_size))

        # Flatten each block into its two Linear layers (fc_layer, output_layer).
        self.layers = []
        keys = jax.random.split(key, 2 * len(block_dims))
        k = 0
        for din, dh, dout in block_dims:
            self.layers.append(init_linear(keys[k], din, dh)); k += 1
            self.layers.append(init_linear(keys[k], dh, dout)); k += 1

    def __call__(self, x):
        return classification_forward(x, self.layers)


# ---------------------------- pure-JAX reference ----------------------------
def _ref_forward(x, layers):
    """Same math as the kernel (bf16 matmul inputs, f32 accumulation)."""
    h = x.astype(jnp.float32)
    for i, (W, b) in enumerate(layers):
        h = jnp.dot(h.astype(jnp.bfloat16), W,
                    preferred_element_type=jnp.float32) + b
        if i % 2 == 0:
            h = jnp.maximum(h, 0.0)
        # Dropout identity (eval mode).
    return h


if __name__ == "__main__":
    # Small config consistent with Classification(input_size, fc_layers_num,
    # fc_units, output_size, rho).
    input_size, fc_layers_num, fc_units, output_size, rho = 64, 3, 128, 8, 0.3
    B = 4

    key = jax.random.PRNGKey(0)
    kx, kp = jax.random.split(key)
    x = jax.random.normal(kx, (B, input_size), jnp.float32)

    model = ClassificationPallas(input_size, fc_layers_num, fc_units, output_size, rho, kp)
    out = jax.block_until_ready(model(x))

    ref = _ref_forward(x, model.layers)

    assert out.shape == (B, output_size), out.shape
    assert jnp.allclose(out, ref, atol=2e-2, rtol=2e-2), float(jnp.max(jnp.abs(out - ref)))
    print("KERNEL_OK")
</pallas_src>

<mosaic_0001>
module attributes {stable_mosaic.version = 11 : i64} {
  func.func @_classification_kernel(%arg0: i32, %arg1: memref<8x64xf32, #tpu.memory_space<vmem>>, %arg2: memref<64x128xbf16, #tpu.memory_space<vmem>>, %arg3: memref<1x128xf32, #tpu.memory_space<vmem>>, %arg4: memref<128x128xbf16, #tpu.memory_space<vmem>>, %arg5: memref<1x128xf32, #tpu.memory_space<vmem>>, %arg6: memref<128x128xbf16, #tpu.memory_space<vmem>>, %arg7: memref<1x128xf32, #tpu.memory_space<vmem>>, %arg8: memref<128x128xbf16, #tpu.memory_space<vmem>>, %arg9: memref<1x128xf32, #tpu.memory_space<vmem>>, %arg10: memref<128x128xbf16, #tpu.memory_space<vmem>>, %arg11: memref<1x128xf32, #tpu.memory_space<vmem>>, %arg12: memref<128x128xbf16, #tpu.memory_space<vmem>>, %arg13: memref<1x128xf32, #tpu.memory_space<vmem>>, %arg14: memref<8x128xf32, #tpu.memory_space<vmem>>) attributes {dimension_semantics = [#tpu.dimension_semantics<parallel>], iteration_bounds = array<i64: 1>, scalar_prefetch = 0 : i64, scratch_operands = 0 : i64, tpu.core_type = #tpu.core_type<tc>, window_params = [{transform_indices = @transform_0, window_bounds = array<i64: 8, 64>}, {pipeline_mode = #tpu.pipeline_mode<synchronous>, transform_indices = @transform_1, window_bounds = array<i64: 64, 128>}, {pipeline_mode = #tpu.pipeline_mode<synchronous>, transform_indices = @transform_2, window_bounds = array<i64: 1, 128>}, {pipeline_mode = #tpu.pipeline_mode<synchronous>, transform_indices = @transform_3, window_bounds = array<i64: 128, 128>}, {pipeline_mode = #tpu.pipeline_mode<synchronous>, transform_indices = @transform_4, window_bounds = array<i64: 1, 128>}, {pipeline_mode = #tpu.pipeline_mode<synchronous>, transform_indices = @transform_5, window_bounds = array<i64: 128, 128>}, {pipeline_mode = #tpu.pipeline_mode<synchronous>, transform_indices = @transform_6, window_bounds = array<i64: 1, 128>}, {pipeline_mode = #tpu.pipeline_mode<synchronous>, transform_indices = @transform_7, window_bounds = array<i64: 128, 128>}, {pipeline_mode = #tpu.pipeline_mode<synchronous>, transform_indices = @transform_8, window_bounds = array<i64: 1, 128>}, {pipeline_mode = #tpu.pipeline_mode<synchronous>, transform_indices = @transform_9, window_bounds = array<i64: 128, 128>}, {pipeline_mode = #tpu.pipeline_mode<synchronous>, transform_indices = @transform_10, window_bounds = array<i64: 1, 128>}, {pipeline_mode = #tpu.pipeline_mode<synchronous>, transform_indices = @transform_11, window_bounds = array<i64: 128, 128>}, {pipeline_mode = #tpu.pipeline_mode<synchronous>, transform_indices = @transform_12, window_bounds = array<i64: 1, 128>}, {transform_indices = @transform_13, window_bounds = array<i64: 8, 128>}]} {
    %c0 = arith.constant 0 : index
    %c0_0 = arith.constant 0 : index
    %0 = vector.load %arg1[%c0, %c0_0] : memref<8x64xf32, #tpu.memory_space<vmem>>, vector<8x64xf32>
    %c0_1 = arith.constant 0 : index
    %c0_2 = arith.constant 0 : index
    %1 = vector.load %arg2[%c0_1, %c0_2] : memref<64x128xbf16, #tpu.memory_space<vmem>>, vector<64x128xbf16>
    %c0_3 = arith.constant 0 : index
    %c0_4 = arith.constant 0 : index
    %2 = vector.load %arg3[%c0_3, %c0_4] : memref<1x128xf32, #tpu.memory_space<vmem>>, vector<1x128xf32>
    %3 = arith.truncf %0 : vector<8x64xf32> to vector<8x64xbf16>
    %cst = arith.constant dense<0.000000e+00> : vector<8x128xf32>
    %4 = tpu.matmul %3, %1, %cst {dimension_numbers = #tpu.dot_dimension_numbers<[1], [0], [0], [1], [0, 0, 1, 1], [], []>} : vector<8x64xbf16>, vector<64x128xbf16>, vector<8x128xf32> -> vector<8x128xf32>
    %5 = vector.broadcast %2 : vector<1x128xf32> to vector<8x128xf32>
    %6 = arith.addf %4, %5 : vector<8x128xf32>
    %cst_5 = arith.constant 0.000000e+00 : f32
    %7 = vector.broadcast %cst_5 : f32 to vector<8x128xf32>
    %8 = arith.maximumf %6, %7 : vector<8x128xf32>
    %c0_6 = arith.constant 0 : index
    %c0_7 = arith.constant 0 : index
    %9 = vector.load %arg4[%c0_6, %c0_7] : memref<128x128xbf16, #tpu.memory_space<vmem>>, vector<128x128xbf16>
    %c0_8 = arith.constant 0 : index
    %c0_9 = arith.constant 0 : index
    %10 = vector.load %arg5[%c0_8, %c0_9] : memref<1x128xf32, #tpu.memory_space<vmem>>, vector<1x128xf32>
    %11 = arith.truncf %8 : vector<8x128xf32> to vector<8x128xbf16>
    %cst_10 = arith.constant dense<0.000000e+00> : vector<8x128xf32>
    %12 = tpu.matmul %11, %9, %cst_10 {dimension_numbers = #tpu.dot_dimension_numbers<[1], [0], [0], [1], [0, 0, 1, 1], [], []>} : vector<8x128xbf16>, vector<128x128xbf16>, vector<8x128xf32> -> vector<8x128xf32>
    %13 = vector.broadcast %10 : vector<1x128xf32> to vector<8x128xf32>
    %14 = arith.addf %12, %13 : vector<8x128xf32>
    %c0_11 = arith.constant 0 : index
    %c0_12 = arith.constant 0 : index
    %15 = vector.load %arg6[%c0_11, %c0_12] : memref<128x128xbf16, #tpu.memory_space<vmem>>, vector<128x128xbf16>
    %c0_13 = arith.constant 0 : index
    %c0_14 = arith.constant 0 : index
    %16 = vector.load %arg7[%c0_13, %c0_14] : memref<1x128xf32, #tpu.memory_space<vmem>>, vector<1x128xf32>
    %17 = arith.truncf %14 : vector<8x128xf32> to vector<8x128xbf16>
    %cst_15 = arith.constant dense<0.000000e+00> : vector<8x128xf32>
    %18 = tpu.matmul %17, %15, %cst_15 {dimension_numbers = #tpu.dot_dimension_numbers<[1], [0], [0], [1], [0, 0, 1, 1], [], []>} : vector<8x128xbf16>, vector<128x128xbf16>, vector<8x128xf32> -> vector<8x128xf32>
    %19 = vector.broadcast %16 : vector<1x128xf32> to vector<8x128xf32>
    %20 = arith.addf %18, %19 : vector<8x128xf32>
    %cst_16 = arith.constant 0.000000e+00 : f32
    %21 = vector.broadcast %cst_16 : f32 to vector<8x128xf32>
    %22 = arith.maximumf %20, %21 : vector<8x128xf32>
    %c0_17 = arith.constant 0 : index
    %c0_18 = arith.constant 0 : index
    %23 = vector.load %arg8[%c0_17, %c0_18] : memref<128x128xbf16, #tpu.memory_space<vmem>>, vector<128x128xbf16>
    %c0_19 = arith.constant 0 : index
    %c0_20 = arith.constant 0 : index
    %24 = vector.load %arg9[%c0_19, %c0_20] : memref<1x128xf32, #tpu.memory_space<vmem>>, vector<1x128xf32>
    %25 = arith.truncf %22 : vector<8x128xf32> to vector<8x128xbf16>
    %cst_21 = arith.constant dense<0.000000e+00> : vector<8x128xf32>
    %26 = tpu.matmul %25, %23, %cst_21 {dimension_numbers = #tpu.dot_dimension_numbers<[1], [0], [0], [1], [0, 0, 1, 1], [], []>} : vector<8x128xbf16>, vector<128x128xbf16>, vector<8x128xf32> -> vector<8x128xf32>
    %27 = vector.broadcast %24 : vector<1x128xf32> to vector<8x128xf32>
    %28 = arith.addf %26, %27 : vector<8x128xf32>
    %c0_22 = arith.constant 0 : index
    %c0_23 = arith.constant 0 : index
    %29 = vector.load %arg10[%c0_22, %c0_23] : memref<128x128xbf16, #tpu.memory_space<vmem>>, vector<128x128xbf16>
    %c0_24 = arith.constant 0 : index
    %c0_25 = arith.constant 0 : index
    %30 = vector.load %arg11[%c0_24, %c0_25] : memref<1x128xf32, #tpu.memory_space<vmem>>, vector<1x128xf32>
    %31 = arith.truncf %28 : vector<8x128xf32> to vector<8x128xbf16>
    %cst_26 = arith.constant dense<0.000000e+00> : vector<8x128xf32>
    %32 = tpu.matmul %31, %29, %cst_26 {dimension_numbers = #tpu.dot_dimension_numbers<[1], [0], [0], [1], [0, 0, 1, 1], [], []>} : vector<8x128xbf16>, vector<128x128xbf16>, vector<8x128xf32> -> vector<8x128xf32>
    %33 = vector.broadcast %30 : vector<1x128xf32> to vector<8x128xf32>
    %34 = arith.addf %32, %33 : vector<8x128xf32>
    %cst_27 = arith.constant 0.000000e+00 : f32
    %35 = vector.broadcast %cst_27 : f32 to vector<8x128xf32>
    %36 = arith.maximumf %34, %35 : vector<8x128xf32>
    %c0_28 = arith.constant 0 : index
    %c0_29 = arith.constant 0 : index
    %37 = vector.load %arg12[%c0_28, %c0_29] : memref<128x128xbf16, #tpu.memory_space<vmem>>, vector<128x128xbf16>
    %c0_30 = arith.constant 0 : index
    %c0_31 = arith.constant 0 : index
    %38 = vector.load %arg13[%c0_30, %c0_31] : memref<1x128xf32, #tpu.memory_space<vmem>>, vector<1x128xf32>
    %39 = arith.truncf %36 : vector<8x128xf32> to vector<8x128xbf16>
    %cst_32 = arith.constant dense<0.000000e+00> : vector<8x128xf32>
    %40 = tpu.matmul %39, %37, %cst_32 {dimension_numbers = #tpu.dot_dimension_numbers<[1], [0], [0], [1], [0, 0, 1, 1], [], []>} : vector<8x128xbf16>, vector<128x128xbf16>, vector<8x128xf32> -> vector<8x128xf32>
    %41 = vector.broadcast %38 : vector<1x128xf32> to vector<8x128xf32>
    %42 = arith.addf %40, %41 : vector<8x128xf32>
    %c0_33 = arith.constant 0 : index
    %c0_34 = arith.constant 0 : index
    %43 = vector.load %arg14[%c0_33, %c0_34] : memref<8x128xf32, #tpu.memory_space<vmem>>, vector<8x128xf32>
    tpu.vector_store %arg14[%c0_33, %c0_34], %42 {strides = array<i32>} : memref<8x128xf32, #tpu.memory_space<vmem>>, vector<8x128xf32>,
    return
  }
  func.func @transform_0(%arg0: i32) -> (i32, i32) {
    %c0_i32 = arith.constant 0 : i32
    %c0_i32_0 = arith.constant 0 : i32
    return %arg0, %c0_i32 : i32, i32
  }
  func.func @transform_1(%arg0: i32) -> (i32, i32) {
    %c0_i32 = arith.constant 0 : i32
    %c0_i32_0 = arith.constant 0 : i32
    %c0_i32_1 = arith.constant 0 : i32
    return %c0_i32, %c0_i32_0 : i32, i32
  }
  func.func @transform_2(%arg0: i32) -> (i32, i32) {
    %c0_i32 = arith.constant 0 : i32
    %c0_i32_0 = arith.constant 0 : i32
    %c0_i32_1 = arith.constant 0 : i32
    return %c0_i32, %c0_i32_0 : i32, i32
  }
  func.func @transform_3(%arg0: i32) -> (i32, i32) {
    %c0_i32 = arith.constant 0 : i32
    %c0_i32_0 = arith.constant 0 : i32
    %c0_i32_1 = arith.constant 0 : i32
    return %c0_i32, %c0_i32_0 : i32, i32
  }
  func.func @transform_4(%arg0: i32) -> (i32, i32) {
    %c0_i32 = arith.constant 0 : i32
    %c0_i32_0 = arith.constant 0 : i32
    %c0_i32_1 = arith.constant 0 : i32
    return %c0_i32, %c0_i32_0 : i32, i32
  }
  func.func @transform_5(%arg0: i32) -> (i32, i32) {
    %c0_i32 = arith.constant 0 : i32
    %c0_i32_0 = arith.constant 0 : i32
    %c0_i32_1 = arith.constant 0 : i32
    return %c0_i32, %c0_i32_0 : i32, i32
  }
  func.func @transform_6(%arg0: i32) -> (i32, i32) {
    %c0_i32 = arith.constant 0 : i32
    %c0_i32_0 = arith.constant 0 : i32
    %c0_i32_1 = arith.constant 0 : i32
    return %c0_i32, %c0_i32_0 : i32, i32
  }
  func.func @transform_7(%arg0: i32) -> (i32, i32) {
    %c0_i32 = arith.constant 0 : i32
    %c0_i32_0 = arith.constant 0 : i32
    %c0_i32_1 = arith.constant 0 : i32
    return %c0_i32, %c0_i32_0 : i32, i32
  }
  func.func @transform_8(%arg0: i32) -> (i32, i32) {
    %c0_i32 = arith.constant 0 : i32
    %c0_i32_0 = arith.constant 0 : i32
    %c0_i32_1 = arith.constant 0 : i32
    return %c0_i32, %c0_i32_0 : i32, i32
  }
  func.func @transform_9(%arg0: i32) -> (i32, i32) {
    %c0_i32 = arith.constant 0 : i32
    %c0_i32_0 = arith.constant 0 : i32
    %c0_i32_1 = arith.constant 0 : i32
    return %c0_i32, %c0_i32_0 : i32, i32
  }
  func.func @transform_10(%arg0: i32) -> (i32, i32) {
    %c0_i32 = arith.constant 0 : i32
    %c0_i32_0 = arith.constant 0 : i32
    %c0_i32_1 = arith.constant 0 : i32
    return %c0_i32, %c0_i32_0 : i32, i32
  }
  func.func @transform_11(%arg0: i32) -> (i32, i32) {
    %c0_i32 = arith.constant 0 : i32
    %c0_i32_0 = arith.constant 0 : i32
    %c0_i32_1 = arith.constant 0 : i32
    return %c0_i32, %c0_i32_0 : i32, i32
  }
  func.func @transform_12(%arg0: i32) -> (i32, i32) {
    %c0_i32 = arith.constant 0 : i32
    %c0_i32_0 = arith.constant 0 : i32
    %c0_i32_1 = arith.constant 0 : i32
    return %c0_i32, %c0_i32_0 : i32, i32
  }
  func.func @transform_13(%arg0: i32) -> (i32, i32) {
    %c0_i32 = arith.constant 0 : i32
    %c0_i32_0 = arith.constant 0 : i32
    return %arg0, %c0_i32 : i32, i32
  }
}

</mosaic_0001>

<bundles_post_ra>
// kernel: tpu_custom_call.1
= control target key start
LH: loop header
LB: loop body
LE: loop exit
PB: predicated region body
PF: predicated region fallthrough
CT: control target
= control target key end

     0   :  { %18 = vsyncpa [#allocation3], 0  ;;  %s1531_s0 = inlined_call_operand.hbm [shape: f32[8,64], index: 0, kind: input, shape index: {}]   ;;  %s1532_s1 = inlined_call_operand.hbm [shape: bf16[64,128], index: 1, kind: input, shape index: {}]   ;;  %s1533_s2 = inlined_call_operand.vmem [shape: f32[1,128], index: 2, kind: input, shape index: {}]   ;;  %s1534_s3 = inlined_call_operand.hbm [shape: bf16[128,128], index: 3, kind: input, shape index: {}]   ;;  %s1535_s4 = inlined_call_operand.vmem [shape: f32[1,128], index: 4, kind: input, shape index: {}]   ;;  %s1536_s5 = inlined_call_operand.hbm [shape: bf16[128,128], index: 5, kind: input, shape index: {}]   ;;  %s1537_s6 = inlined_call_operand.vmem [shape: f32[1,128], index: 6, kind: input, shape index: {}]   ;;  %s1538_s7 = inlined_call_operand.hbm [shape: bf16[128,128], index: 7, kind: input, shape index: {}]   ;;  %s1539_s8 = inlined_call_operand.vmem [shape: f32[1,128], index: 8, kind: input, shape index: {}]   ;;  %s1540_s9 = inlined_call_operand.hbm [shape: bf16[128,128], index: 9, kind: input, shape index: {}]   ;;  %s1541_s10 = inlined_call_operand.vmem [shape: f32[1,128], index: 10, kind: input, shape index: {}]   ;;  %s1542_s11 = inlined_call_operand.hbm [shape: bf16[128,128], index: 11, kind: input, shape index: {}]   ;;  %s1543_s12 = inlined_call_operand.vmem [shape: f32[1,128], index: 12, kind: input, shape index: {}]   ;;  %s1544_s13 = inlined_call_operand.hbm [shape: f32[8,128], index: 13, kind: output, shape index: {}]  }
   0x1   :  { %19 = vsyncpa [#allocation6], 0 }
   0x2   :  { %20 = vsyncpa [#allocation9], 0 }
   0x3   :  { %21 = vsyncpa [#allocation12], 0 }
   0x4   :  { %22 = vsyncpa [#allocation4], 0  ;;  %s1261_s25 = smov [#allocation5]   ;;  %s1075_s29 = scalar_lea.hbm %s1532_s1, 512 }
   0x5   :  { %s38_s26 = sshll.u32 %s1261_s25, 4  ;;  %p1076_p0 = scmp.ne.s32.totalorder %s1532_s1, %s1075_s29  ;;  %s39_s26 = int_to_ptr.vmem [resolvable:$true] %s38_s26 }
   0x6   :  { %p1079_p1 = scmp.lt.u32.totalorder %s1075_s29, %s1532_s1 }
   0x8   :  { %p1081_p2 = pnand %p1079_p1, %p1076_p0 }
   0xa   :  { %1084 = shalt.err (!%p1081_p2)
}
   0xb   :  { %s1085_s17 = scalar_lea.vmem %s39_s26, 512  ;;  %p1090_p4 = scmp.lt.s32.totalorder %s39_s26, %s39_s26 }
   0xc   :  { %p1086_p3 = scmp.ne.s32.totalorder %s39_s26, %s1085_s17  ;;  %p1091_p5 = scmp.lt.s32.totalorder %s1085_s17, %s1085_s17 }
   0xe   :  { %p1092_p6 = por %p1091_p5, %p1090_p4 }
  0x10   :  { %p1093_p7 = pnand %p1092_p6, %p1086_p3 }
  0x12   :  { %1096 = shalt.err (!%p1093_p7)
}
  0x13   :  { %s1262_s18 = smov 64   ;;  %s1263_s19 = smov 4  }
  0x14   :  { %44 = dma.hbm_to_vmem [thread:$0]  %s1532_s1, 512, %s39_s26, [#allocation6], %s1262_s18, %s1262_s18, %s1263_s19  }
  0x15   :  { %s1264_s22 = smov [#allocation8]   ;;  %s1265_s24 = smov [#allocation11]  }
  0x16   :  { %s66_s23 = sshll.u32 %s1264_s22, 4  ;;  %s94_s25 = sshll.u32 %s1265_s24, 4  ;;  %s67_s23 = int_to_ptr.vmem [resolvable:$true] %s66_s23  ;;  %s95_s25 = int_to_ptr.vmem [resolvable:$true] %s94_s25 }
  0x17   :  { %s1097_s29 = scalar_lea.hbm %s1536_s5, 1024 }
  0x18   :  { %p1098_p8 = scmp.ne.s32.totalorder %s1536_s5, %s1097_s29  ;;  %p1101_p9 = scmp.lt.u32.totalorder %s1097_s29, %s1536_s5 }
  0x1a   :  { %p1103_p10 = pnand %p1101_p9, %p1098_p8 }
  0x1c   :  { %1106 = shalt.err (!%p1103_p10)
}
  0x1d   :  { %s1107_s1 = scalar_lea.vmem %s67_s23, 1024  ;;  %p1112_p12 = scmp.lt.s32.totalorder %s67_s23, %s67_s23 }
  0x1e   :  { %p1108_p11 = scmp.ne.s32.totalorder %s67_s23, %s1107_s1  ;;  %p1113_p13 = scmp.lt.s32.totalorder %s1107_s1, %s1107_s1 }
  0x20   :  { %p1114_p0 = por %p1113_p13, %p1112_p12 }
  0x22   :  { %p1115_p1 = pnand %p1114_p0, %p1108_p11 }
  0x24   :  { %1118 = shalt.err (!%p1115_p1)
}
  0x25   :  { %72 = dma.hbm_to_vmem [thread:$0]  %s1536_s5, 1024, %s67_s23, [#allocation9], %s1262_s18, %s1262_s18, %s1263_s19  }
  0x26   :  { %s1119_s22 = scalar_lea.hbm %s1540_s9, 1024 }
  0x27   :  { %p1120_p2 = scmp.ne.s32.totalorder %s1540_s9, %s1119_s22  ;;  %p1123_p3 = scmp.lt.u32.totalorder %s1119_s22, %s1540_s9 }
  0x29   :  { %p1125_p4 = pnand %p1123_p3, %p1120_p2 }
  0x2b   :  { %1128 = shalt.err (!%p1125_p4)
}
  0x2c   :  { %s1129_s30 = scalar_lea.vmem %s95_s25, 1024  ;;  %p1134_p6 = scmp.lt.s32.totalorder %s95_s25, %s95_s25 }
  0x2d   :  { %p1130_p5 = scmp.ne.s32.totalorder %s95_s25, %s1129_s30  ;;  %p1135_p7 = scmp.lt.s32.totalorder %s1129_s30, %s1129_s30 }
  0x2f   :  { %p1136_p8 = por %p1135_p7, %p1134_p6 }
  0x31   :  { %p1137_p9 = pnand %p1136_p8, %p1130_p5 }
  0x33   :  { %1140 = shalt.err (!%p1137_p9)
}
  0x34   :  { %100 = dma.hbm_to_vmem [thread:$0]  %s1540_s9, 1024, %s95_s25, [#allocation12], %s1262_s18, %s1262_s18, %s1263_s19  }
  0x35   :  { %s1266_s14 = smov [#allocation2]   ;;  %s1267_s16 = smov [#allocation7]  }
  0x36   :  { %s29_s15 = sshll.u32 %s1266_s14, 4  ;;  %s52_s1 = sshll.u32 %s1267_s16, 4  ;;  %s30_s15 = int_to_ptr.vmem [resolvable:$true] %s29_s15  ;;  %s53_s1 = int_to_ptr.vmem [resolvable:$true] %s52_s1 }
  0x37   :  { %s1141_s20 = scalar_lea.hbm %s1531_s0, 128 }
  0x38   :  { %p1142_p10 = scmp.ne.s32.totalorder %s1531_s0, %s1141_s20  ;;  %p1145_p11 = scmp.lt.u32.totalorder %s1141_s20, %s1531_s0 }
  0x3a   :  { %p1147_p12 = pnand %p1145_p11, %p1142_p10 }
  0x3c   :  { %1150 = shalt.err (!%p1147_p12)
}
  0x3d   :  { %s1151_s9 = scalar_lea.vmem %s30_s15, 128  ;;  %p1156_p0 = scmp.lt.s32.totalorder %s30_s15, %s30_s15 }
  0x3e   :  { %p1152_p13 = scmp.ne.s32.totalorder %s30_s15, %s1151_s9  ;;  %p1157_p1 = scmp.lt.s32.totalorder %s1151_s9, %s1151_s9 }
  0x40   :  { %p1158_p2 = por %p1157_p1, %p1156_p0 }
  0x42   :  { %p1159_p3 = pnand %p1158_p2, %p1152_p13 }
  0x44   :  { %1162 = shalt.err (!%p1159_p3)
}
  0x45   :  { %32 = dma.hbm_to_vmem [thread:$0]  %s1531_s0, 128, %s30_s15, [#allocation3]  }
  0x46   :  { %s1163_s5 = scalar_lea.hbm %s1534_s3, 1024 }
  0x47   :  { %p1164_p4 = scmp.ne.s32.totalorder %s1534_s3, %s1163_s5  ;;  %p1167_p5 = scmp.lt.u32.totalorder %s1163_s5, %s1534_s3 }
  0x49   :  { %p1169_p6 = pnand %p1167_p5, %p1164_p4 }
  0x4b   :  { %1172 = shalt.err (!%p1169_p6)
}
  0x4c   :  { %s1173_s17 = scalar_lea.vmem %s53_s1, 1024  ;;  %p1178_p8 = scmp.lt.s32.totalorder %s53_s1, %s53_s1 }
  0x4d   :  { %p1174_p7 = scmp.ne.s32.totalorder %s53_s1, %s1173_s17  ;;  %p1179_p9 = scmp.lt.s32.totalorder %s1173_s17, %s1173_s17 }
  0x4f   :  { %p1180_p10 = por %p1179_p9, %p1178_p8 }
  0x51   :  { %p1181_p11 = pnand %p1180_p10, %p1174_p7 }
  0x53   :  { %1184 = shalt.err (!%p1181_p11)
}
  0x54   :  { %58 = dma.hbm_to_vmem [thread:$0]  %s1534_s3, 1024, %s53_s1, [#allocation6], %s1262_s18, %s1262_s18, %s1263_s19  }
  0x55   :  { %s1268_s20 = smov [#allocation10]   ;;  %s1269_s22 = smov [#allocation13]  }
  0x56   :  { %s80_s21 = sshll.u32 %s1268_s20, 4  ;;  %s108_s24 = sshll.u32 %s1269_s22, 4  ;;  %s81_s21 = int_to_ptr.vmem [resolvable:$true] %s80_s21  ;;  %s109_s24 = int_to_ptr.vmem [resolvable:$true] %s108_s24 }
  0x57   :  { %s1185_s25 = scalar_lea.hbm %s1538_s7, 1024 }
  0x58   :  { %p1186_p12 = scmp.ne.s32.totalorder %s1538_s7, %s1185_s25  ;;  %p1189_p13 = scmp.lt.u32.totalorder %s1185_s25, %s1538_s7 }
  0x5a   :  { %p1191_p0 = pnand %p1189_p13, %p1186_p12 }
  0x5c   :  { %1194 = shalt.err (!%p1191_p0)
}
  0x5d   :  { %s1195_s3 = scalar_lea.vmem %s81_s21, 1024  ;;  %p1200_p2 = scmp.lt.s32.totalorder %s81_s21, %s81_s21 }
  0x5e   :  { %p1196_p1 = scmp.ne.s32.totalorder %s81_s21, %s1195_s3  ;;  %p1201_p3 = scmp.lt.s32.totalorder %s1195_s3, %s1195_s3 }
  0x60   :  { %p1202_p4 = por %p1201_p3, %p1200_p2 }
  0x62   :  { %p1203_p5 = pnand %p1202_p4, %p1196_p1 }
  0x64   :  { %1206 = shalt.err (!%p1203_p5)
}
  0x65   :  { %86 = dma.hbm_to_vmem [thread:$0]  %s1538_s7, 1024, %s81_s21, [#allocation9], %s1262_s18, %s1262_s18, %s1263_s19  }
  0x66   :  { %s1207_s26 = scalar_lea.hbm %s1542_s11, 1024 }
  0x67   :  { %p1208_p6 = scmp.ne.s32.totalorder %s1542_s11, %s1207_s26  ;;  %p1211_p7 = scmp.lt.u32.totalorder %s1207_s26, %s1542_s11 }
  0x69   :  { %p1213_p8 = pnand %p1211_p7, %p1208_p6 }
  0x6b   :  { %1216 = shalt.err (!%p1213_p8)
}
  0x6c   :  { %s1217_s22 = scalar_lea.vmem %s109_s24, 1024  ;;  %p1222_p10 = scmp.lt.s32.totalorder %s109_s24, %s109_s24 }
  0x6d   :  { %p1218_p9 = scmp.ne.s32.totalorder %s109_s24, %s1217_s22  ;;  %p1223_p11 = scmp.lt.s32.totalorder %s1217_s22, %s1217_s22 }
  0x6f   :  { %p1224_p12 = por %p1223_p11, %p1222_p10 }
  0x71   :  { %p1225_p13 = pnand %p1224_p12, %p1218_p9 }
  0x73   :  { %1228 = shalt.err (!%p1225_p13)
}
  0x74   :  { %114 = dma.hbm_to_vmem [thread:$0]  %s1542_s11, 1024, %s109_s24, [#allocation12], %s1262_s18, %s1262_s18, %s1263_s19  }
  0x75   :  { %1251 = dma.done.wait [#allocation3], 128  }
  0x76   :  { %1252 = vsyncadd [#allocation3], 4294967168 }
  0x77   :  { %1253 = dma.done.wait [#allocation6], 1536  }
  0x78   :  { %1254 = vsyncadd [#allocation6], 4294965760 }
  0x79   :  { %1255 = dma.done.wait [#allocation9], 2048  }
  0x7a   :  { %1256 = vsyncadd [#allocation9], 4294965248 }
  0x7b   :  { %1257 = dma.done.wait [#allocation12], 2048  }
  0x7c   :  { %1258 = vsyncadd [#allocation12], 4294965248  ;;  %v1270_v0 = vmov 0.0   ;;  %vm1271_vm0 = vmmov 0   ;;  %v1031_v1 = vld [vmem:[#allocation5] sm:$0xff]   ;;  %v1032_v2 = vld [vmem:[#allocation5 + $0x8] sm:$0xff]  }
  0x7d   :  { %907 = vmatprep.subr.bf16.mxu0 %v1270_v0  ;;  %915 = vmatprep.mubr.msk.bf16.mxu0 %vm1271_vm0, %v1270_v0  ;;  %v1035_v3 = vld [vmem:[#allocation7] sm:$0xff]   ;;  %v1033_v4 = vld [vmem:[#allocation5 + $0x10] sm:$0xff]   ;;  %v1036_v5 = vld [vmem:[#allocation7 + $0x8] sm:$0xff]   ;;  %vm180_vm1 = vcmask 523264   ;;  %s1272_s29 = smov [#allocation14]  }
  0x7e   :  { %919 = vmatprep.subr.bf16.mxu1 %v1270_v0  ;;  %935 = vmatprep.mubr.msk.bf16.mxu1 %vm1271_vm0, %v1270_v0  ;;  %v1034_v6 = vld [vmem:[#allocation5 + $0x18] sm:$0xff]   ;;  %v1037_v8 = vld [vmem:[#allocation7 + $0x10] sm:$0xff]   ;;  %v1039_v11 = vld [vmem:[#allocation7 + $0x20] sm:$0xff]   ;;  %s794_s30 = sshll.u32 %s1272_s29, 4  ;;  %s795_s30 = int_to_ptr.vmem [resolvable:$true] %s794_s30 }
  0x7f   :  { %908 = vmatpush3.bf16.msra.mxu0 %v1031_v1  ;;  %920 = vmatpush3.bf16.msra.mxu1 %v1035_v3  ;;  %v139_v7 = vld [vmem:[#allocation2] sm:$0xff]  ;;  %v1040_v12 = vld [vmem:[#allocation7 + $0x28] sm:$0xff]   ;;  %v1041_v13 = vld [vmem:[#allocation7 + $0x30] sm:$0xff]   ;;  %p1234_p1 = scmp.lt.s32.totalorder %s795_s30, %s795_s30 }
  0x80   :  { %909 = vmatprep.subr.bf16.mxu0 %v1270_v0  ;;  %921 = vmatprep.subr.bf16.mxu1 %v1270_v0  ;;  %v149_v9 = vpack.c.bf16 %v139_v7, %v139_v7  ;;  %v1038_v10 = vld [vmem:[#allocation7 + $0x18] sm:$0xff]   ;;  %v1043_v15 = vld [vmem:[#allocation8] sm:$0xff]   ;;  %v1044_v16 = vld [vmem:[#allocation8 + $0x8] sm:$0xff]  }
  0x81   :  { %v1042_v14 = vld [vmem:[#allocation7 + $0x38] sm:$0xff]   ;;  %v1045_v17 = vld [vmem:[#allocation8 + $0x10] sm:$0xff]   ;;  %v1047_v19 = vld [vmem:[#allocation8 + $0x20] sm:$0xff]  }
  0x82   :  { %v1046_v18 = vld [vmem:[#allocation8 + $0x18] sm:$0xff]   ;;  %v1048_v20 = vld [vmem:[#allocation8 + $0x28] sm:$0xff]   ;;  %v1049_v21 = vld [vmem:[#allocation8 + $0x30] sm:$0xff]  }
  0x83   :  { %910 = vmatpush3.bf16.msra.mxu0 %v1032_v2  ;;  %922 = vmatpush3.bf16.msra.mxu1 %v1036_v5  ;;  %v806_v22 = vld [vmem:[%s1533_s2] ss:$0 sm:$0xff]  ;;  %v1051_v31 = vld [vmem:[#allocation10] sm:$0xff]   ;;  %v1052_v32 = vld [vmem:[#allocation10 + $0x8] sm:$0xff]  }
  0x84   :  { %911 = vmatprep.subr.bf16.mxu0 %v1270_v0  ;;  %923 = vmatprep.subr.bf16.mxu1 %v1270_v0  ;;  %v1050_v30 = vld [vmem:[#allocation8 + $0x38] sm:$0xff]   ;;  %v1053_v33 = vld [vmem:[#allocation10 + $0x10] sm:$0xff]   ;;  %v1055_v35 = vld [vmem:[#allocation10 + $0x20] sm:$0xff]  }
  0x85   :  { %v1054_v34 = vld [vmem:[#allocation10 + $0x18] sm:$0xff]   ;;  %v1056_v36 = vld [vmem:[#allocation10 + $0x28] sm:$0xff]   ;;  %v1057_v44 = vld [vmem:[#allocation10 + $0x30] sm:$0xff]  }
  0x86   :  { %v812_v37 = vld [vmem:[%s1535_s4] ss:$0 sm:$0xff]  ;;  %v1059_v46 = vld [vmem:[#allocation11] sm:$0xff]   ;;  %v1060_v47 = vld [vmem:[#allocation11 + $0x8] sm:$0xff]  }
  0x87   :  { %912 = vmatpush3.bf16.msra.mxu0 %v1033_v4  ;;  %924 = vmatpush3.bf16.msra.mxu1 %v1037_v8  ;;  %v1058_v45 = vld [vmem:[#allocation10 + $0x38] sm:$0xff]   ;;  %v1061_v48 = vld [vmem:[#allocation11 + $0x10] sm:$0xff]   ;;  %v1063_v50 = vld [vmem:[#allocation11 + $0x20] sm:$0xff]  }
  0x88   :  { %913 = vmatprep.subr.bf16.mxu0 %v1270_v0  ;;  %925 = vmatprep.subr.bf16.mxu1 %v1270_v0  ;;  %v1062_v49 = vld [vmem:[#allocation11 + $0x18] sm:$0xff]   ;;  %v1064_v51 = vld [vmem:[#allocation11 + $0x28] sm:$0xff]   ;;  %v1065_v52 = vld [vmem:[#allocation11 + $0x30] sm:$0xff]  }
  0x89   :  { %v821_v53 = vld [vmem:[%s1537_s6] ss:$0 sm:$0xff]  ;;  %v1067_v62 = vld [vmem:[#allocation13] sm:$0xff]   ;;  %v1068_v63 = vld [vmem:[#allocation13 + $0x8] sm:$0xff]  }
  0x8a   :  { %v1066_v61 = vld [vmem:[#allocation11 + $0x38] sm:$0xff]   ;;  %v1069_v1 = vld [vmem:[#allocation13 + $0x10] sm:$0xff]   ;;  %v1071_v3 = vld [vmem:[#allocation13 + $0x20] sm:$0xff]  }
  0x8b   :  { %914 = vmatpush3.bf16.msra.mxu0 %v1034_v6  ;;  %926 = vmatpush3.bf16.msra.mxu1 %v1038_v10  ;;  %v1070_v2 = vld [vmem:[#allocation13 + $0x18] sm:$0xff]   ;;  %v1072_v4 = vld [vmem:[#allocation13 + $0x28] sm:$0xff]  }
  0x8c   :  { %939 = vmatprep.subr.bf16.mxu0 %v1270_v0  ;;  %927 = vmatprep.subr.bf16.mxu1 %v1270_v0  ;;  %v830_v5 = vld [vmem:[%s1539_s8] ss:$0 sm:$0xff] }
  0x8e   :  { %916 = vmatmul.mubr.msk.bf16.vlgmr.msra.gmra.mrb[0].mxu0 %vm180_vm1, %v149_v9 }
  0x8f   :  { %955 = vmatprep.mubr.msk.bf16.mxu0 %vm1271_vm0, %v1270_v0  ;;  %928 = vmatpush3.bf16.msra.mxu1 %v1039_v11 }
  0x90   :  { %929 = vmatprep.subr.bf16.mxu1 %v1270_v0  ;;  %940 = vmatpush3.bf16.msra.mxu0 %v1043_v15 }
  0x91   :  { %941 = vmatprep.subr.bf16.mxu0 %v1270_v0 }
  0x93   :  { %930 = vmatpush3.bf16.msra.mxu1 %v1040_v12  ;;  %v1073_v12 = vld [vmem:[#allocation13 + $0x30] sm:$0xff]  }
  0x94   :  { %931 = vmatprep.subr.bf16.mxu1 %v1270_v0  ;;  %942 = vmatpush3.bf16.msra.mxu0 %v1044_v16 }
  0x95   :  { %943 = vmatprep.subr.bf16.mxu0 %v1270_v0 }
  0x97   :  { %932 = vmatpush3.bf16.msra.mxu1 %v1041_v13  ;;  %v1074_v13 = vld [vmem:[#allocation13 + $0x38] sm:$0xff]  }
  0x98   :  { %933 = vmatprep.subr.bf16.mxu1 %v1270_v0  ;;  %944 = vmatpush3.bf16.msra.mxu0 %v1045_v17 }
  0x99   :  { %945 = vmatprep.subr.bf16.mxu0 %v1270_v0 }
  0x9b   :  { %934 = vmatpush3.bf16.msra.mxu1 %v1042_v14  ;;  %v839_v14 = vld [vmem:[%s1541_s10] ss:$0 sm:$0xff]  ;;  %s1229_s10 = scalar_lea.vmem %s795_s30, 128 }
  0x9c   :  { %959 = vmatprep.subr.bf16.mxu1 %v1270_v0  ;;  %946 = vmatpush3.bf16.msra.mxu0 %v1046_v18  ;;  %p1230_p0 = scmp.ne.s32.totalorder %s795_s30, %s1229_s10  ;;  %p1235_p2 = scmp.lt.s32.totalorder %s1229_s10, %s1229_s10 }
  0x9d   :  { %947 = vmatprep.subr.bf16.mxu0 %v1270_v0 }
  0x9e   :  { %p1236_p3 = por %p1235_p2, %p1234_p1 }
  0xa0   :  { %948 = vmatpush3.bf16.msra.mxu0 %v1047_v19  ;;  %p1237_p4 = pnand %p1236_p3, %p1230_p0 }
  0xa1   :  { %949 = vmatprep.subr.bf16.mxu0 %v1270_v0 }
  0xa4   :  { %950 = vmatpush3.bf16.msra.mxu0 %v1048_v20 }
  0xa5   :  { %951 = vmatprep.subr.bf16.mxu0 %v1270_v0 }
  0xa8   :  { %952 = vmatpush3.bf16.msra.mxu0 %v1049_v21 }
  0xa9   :  { %953 = vmatprep.subr.bf16.mxu0 %v1270_v0 }
  0xac   :  { %954 = vmatpush3.bf16.msra.mxu0 %v1050_v30 }
  0xad   :  { %979 = vmatprep.subr.bf16.mxu0 %v1270_v0 }
 0x161   :  { %v218_v23 = vpop.f32.mrb[0].mxu0 }
 0x162   :  { %v219_v24 = vadd.f32 %v806_v22, %v218_v23  ;;  %v917_v25 = vpop.f32.mrb[1].mxu0  ;;  %v848_v22 = vld [vmem:[%s1543_s12] ss:$0 sm:$0xff] }
 0x163   :  { %v221_v26 = vpop.f32.mrb[2].mxu0 }
 0x164   :  { %v224_v27 = vmax.f32 %v219_v24, 0.0  ;;  %v918_v28 = vpop.f32.mrb[3].mxu0 }
 0x166   :  { %v242_v29 = vpack.c.bf16 %v224_v27, %v224_v27 }
 0x168   :  { %936 = vmatmul.mubr.bf16.vlgmr.msra.gmra.mrb[0].mxu1 %v242_v29 }
 0x169   :  { %975 = vmatprep.mubr.msk.bf16.mxu1 %vm1271_vm0, %v1270_v0  ;;  %960 = vmatpush3.bf16.msra.mxu1 %v1051_v31 }
 0x16a   :  { %961 = vmatprep.subr.bf16.mxu1 %v1270_v0 }
 0x16d   :  { %962 = vmatpush3.bf16.msra.mxu1 %v1052_v32 }
 0x16e   :  { %963 = vmatprep.subr.bf16.mxu1 %v1270_v0 }
 0x171   :  { %964 = vmatpush3.bf16.msra.mxu1 %v1053_v33 }
 0x172   :  { %965 = vmatprep.subr.bf16.mxu1 %v1270_v0 }
 0x175   :  { %966 = vmatpush3.bf16.msra.mxu1 %v1054_v34 }
 0x176   :  { %967 = vmatprep.subr.bf16.mxu1 %v1270_v0 }
 0x179   :  { %968 = vmatpush3.bf16.msra.mxu1 %v1055_v35 }
 0x17a   :  { %969 = vmatprep.subr.bf16.mxu1 %v1270_v0 }
 0x17d   :  { %970 = vmatpush3.bf16.msra.mxu1 %v1056_v36 }
 0x17e   :  { %971 = vmatprep.subr.bf16.mxu1 %v1270_v0 }
 0x181   :  { %972 = vmatpush3.bf16.msra.mxu1 %v1057_v44 }
 0x182   :  { %973 = vmatprep.subr.bf16.mxu1 %v1270_v0 }
 0x185   :  { %974 = vmatpush3.bf16.msra.mxu1 %v1058_v45 }
 0x186   :  { %999 = vmatprep.subr.bf16.mxu1 %v1270_v0 }
 0x23b   :  { %v331_v38 = vpop.f32.mrb[0].mxu1 }
 0x23c   :  { %v332_v39 = vadd.f32 %v812_v37, %v331_v38  ;;  %v937_v40 = vpop.f32.mrb[1].mxu1 }
 0x23d   :  { %v334_v41 = vpop.f32.mrb[2].mxu1 }
 0x23e   :  { %v354_v42 = vpack.c.bf16 %v332_v39, %v332_v39  ;;  %v938_v43 = vpop.f32.mrb[3].mxu1 }
 0x240   :  { %956 = vmatmul.mubr.bf16.vlgmr.msra.gmra.mrb[4].mxu0 %v354_v42 }
 0x241   :  { %995 = vmatprep.mubr.msk.bf16.mxu0 %vm1271_vm0, %v1270_v0  ;;  %980 = vmatpush3.bf16.msra.mxu0 %v1059_v46 }
 0x242   :  { %981 = vmatprep.subr.bf16.mxu0 %v1270_v0 }
 0x245   :  { %982 = vmatpush3.bf16.msra.mxu0 %v1060_v47 }
 0x246   :  { %983 = vmatprep.subr.bf16.mxu0 %v1270_v0 }
 0x249   :  { %984 = vmatpush3.bf16.msra.mxu0 %v1061_v48 }
 0x24a   :  { %985 = vmatprep.subr.bf16.mxu0 %v1270_v0 }
 0x24d   :  { %986 = vmatpush3.bf16.msra.mxu0 %v1062_v49 }
 0x24e   :  { %987 = vmatprep.subr.bf16.mxu0 %v1270_v0 }
 0x251   :  { %988 = vmatpush3.bf16.msra.mxu0 %v1063_v50 }
 0x252   :  { %989 = vmatprep.subr.bf16.mxu0 %v1270_v0 }
 0x255   :  { %990 = vmatpush3.bf16.msra.mxu0 %v1064_v51 }
 0x256   :  { %991 = vmatprep.subr.bf16.mxu0 %v1270_v0 }
 0x259   :  { %992 = vmatpush3.bf16.msra.mxu0 %v1065_v52 }
 0x25a   :  { %993 = vmatprep.subr.bf16.mxu0 %v1270_v0 }
 0x25d   :  { %994 = vmatpush3.bf16.msra.mxu0 %v1066_v61 }
 0x313   :  { %v443_v54 = vpop.f32.mrb[4].mxu0 }
 0x314   :  { %v444_v55 = vadd.f32 %v821_v53, %v443_v54  ;;  %v957_v56 = vpop.f32.mrb[5].mxu0 }
 0x315   :  { %v446_v57 = vpop.f32.mrb[6].mxu0 }
 0x316   :  { %v449_v58 = vmax.f32 %v444_v55, 0.0  ;;  %v958_v59 = vpop.f32.mrb[7].mxu0 }
 0x318   :  { %v467_v60 = vpack.c.bf16 %v449_v58, %v449_v58 }
 0x31a   :  { %976 = vmatmul.mubr.bf16.vlgmr.msra.gmra.mrb[4].mxu1 %v467_v60 }
 0x31b   :  { %1015 = vmatprep.mubr.msk.bf16.mxu1 %vm1271_vm0, %v1270_v0  ;;  %1000 = vmatpush3.bf16.msra.mxu1 %v1067_v62 }
 0x31c   :  { %1001 = vmatprep.subr.bf16.mxu1 %v1270_v0 }
 0x31f   :  { %1002 = vmatpush3.bf16.msra.mxu1 %v1068_v63 }
 0x320   :  { %1003 = vmatprep.subr.bf16.mxu1 %v1270_v0 }
 0x323   :  { %1004 = vmatpush3.bf16.msra.mxu1 %v1069_v1 }
 0x324   :  { %1005 = vmatprep.subr.bf16.mxu1 %v1270_v0 }
 0x327   :  { %1006 = vmatpush3.bf16.msra.mxu1 %v1070_v2 }
 0x328   :  { %1007 = vmatprep.subr.bf16.mxu1 %v1270_v0 }
 0x32b   :  { %1008 = vmatpush3.bf16.msra.mxu1 %v1071_v3 }
 0x32c   :  { %1009 = vmatprep.subr.bf16.mxu1 %v1270_v0 }
 0x32f   :  { %1010 = vmatpush3.bf16.msra.mxu1 %v1072_v4 }
 0x330   :  { %1011 = vmatprep.subr.bf16.mxu1 %v1270_v0 }
 0x333   :  { %1012 = vmatpush3.bf16.msra.mxu1 %v1073_v12 }
 0x334   :  { %1013 = vmatprep.subr.bf16.mxu1 %v1270_v0 }
 0x337   :  { %1014 = vmatpush3.bf16.msra.mxu1 %v1074_v13 }
 0x3ed   :  { %v556_v6 = vpop.f32.mrb[4].mxu1 }
 0x3ee   :  { %v557_v7 = vadd.f32 %v830_v5, %v556_v6  ;;  %v977_v8 = vpop.f32.mrb[5].mxu1 }
 0x3ef   :  { %v559_v9 = vpop.f32.mrb[6].mxu1 }
 0x3f0   :  { %v579_v10 = vpack.c.bf16 %v557_v7, %v557_v7  ;;  %v978_v11 = vpop.f32.mrb[7].mxu1 }
 0x3f2   :  { %996 = vmatmul.mubr.bf16.vlgmr.msra.gmra.mrb[8].mxu0 %v579_v10 }
 0x4c5   :  { %v668_v15 = vpop.f32.mrb[8].mxu0 }
 0x4c6   :  { %v669_v16 = vadd.f32 %v839_v14, %v668_v15  ;;  %v997_v17 = vpop.f32.mrb[9].mxu0 }
 0x4c7   :  { %v671_v18 = vpop.f32.mrb[10].mxu0 }
 0x4c8   :  { %v674_v19 = vmax.f32 %v669_v16, 0.0  ;;  %v998_v20 = vpop.f32.mrb[11].mxu0 }
 0x4ca   :  { %v692_v21 = vpack.c.bf16 %v674_v19, %v674_v19 }
 0x4cc   :  { %1016 = vmatmul.mubr.bf16.vlgmr.msra.gmra.mrb[8].mxu1 %v692_v21 }
 0x59f   :  { %v781_v0 = vpop.f32.mrb[8].mxu1 }
 0x5a0   :  { %v782_v23 = vadd.f32 %v848_v22, %v781_v0  ;;  %v1017_v24 = vpop.f32.mrb[9].mxu1 }
 0x5a1   :  { %v784_v25 = vpop.f32.mrb[10].mxu1 }
 0x5a2   :  { %787 = vst [vmem:[#allocation14] sm:$0xff] %v782_v23  ;;  %v1018_v26 = vpop.f32.mrb[11].mxu1 }
 0x5a3   :  { %1240 = shalt.err (!%p1237_p4)
}
 0x5a4   :  { %s1241_s12 = scalar_lea.hbm %s1544_s13, 128 }
 0x5a5   :  { %p1242_p5 = scmp.ne.s32.totalorder %s1544_s13, %s1241_s12  ;;  %p1245_p6 = scmp.lt.u32.totalorder %s1241_s12, %s1544_s13 }
 0x5a7   :  { %p1247_p7 = pnand %p1245_p6, %p1242_p5 }
 0x5a9   :  { %1250 = shalt.err (!%p1247_p7)
}
 0x5aa   :  { %797 = dma.vmem_to_hbm [thread:$0]  %s795_s30, 128, %s1544_s13, [#allocation4]  }
 0x5ab   :  { %1259 = dma.done.wait [#allocation4], 128  }
 0x5ac   :  { %1260 = vsyncadd [#allocation4], 4294967168 }
 0x5ad   :  { %801 = vsyncpa [#allocation3], 1 }
 0x5ae   :  { %802 = vsyncpa [#allocation6], 1 }
 0x5af   :  { %803 = vsyncpa [#allocation9], 1 }
 0x5b0   :  { %804 = vsyncpa [#allocation12], 1 }
 0x5b1   :  { %805 = vsyncpa [#allocation4], 1 }

</bundles_post_ra>
